<compile_context>
chip_gen: v7x
topology: tpu7x:2x2x1
jax: 0.10.0
libtpu: 0.0.40
codegen_flags: <defaults>
</compile_context>

<pallas_src>
import math

import jax
import jax.numpy as jnp
from jax import lax
from jax.experimental import pallas as pl
from jax.experimental.pallas import tpu as pltpu

EPSILON = 1e-08
MIB = 1024 * 1024
_N_SPLIT = 2          # leading "parallel" grid axis -> 2 TensorCores on v7x
_SUB = 8              # f32 sublanes per vreg (accumulator height)


def _vmem_capacity_bytes():
    """Physical VMEM per TensorCore; conservative (v7x-sized) fallback."""
    try:
        cap = int(getattr(pltpu.get_tpu_info(), "vmem_capacity_bytes"))
        if cap > 0:
            return cap
    except Exception:
        pass
    return 64 * MIB


def _default_use_mxu_colsums():
    """MXU column-sum offload only pays where the VALU slot binds (v7x)."""
    try:
        kind = jax.devices()[0].device_kind.lower()
    except Exception:
        return False
    return ("v7" in kind) or ("tpu7" in kind)


def _choose_tile_rows(per_core_rows, cp, p_itemsize, y_itemsize, with_bce,
                      budget_bytes, max_tile_rows=None):
    """Largest 16-aligned row tile whose VMEM footprint (lane-padded, incl. the
    f32 working set and double-buffered inputs) stays within budget; rebalanced
    so the zero-row padding stays small."""
    lanes = -(-cp // 128) * 128                       # lane-padded width in VMEM
    work_copies = 7 if with_bce else 4                # f32 temporaries of the chain
    per_row = lanes * ((p_itemsize + y_itemsize) * 2 + 4 * work_copies)
    t = int(budget_bytes // max(per_row, 1))
    t = max(16, min(t, 16384))
    t = (t // 16) * 16
    if max_tile_rows is not None:
        t = min(t, max(16, (int(max_tile_rows) // 16) * 16))
    need = max(16, (-(-per_core_rows // 16)) * 16)    # one step per core suffices
    t = min(t, need)
    steps = -(-per_core_rows // t)                    # ceil
    t = max(16, ((-(-per_core_rows // steps)) + 15) // 16 * 16)   # rebalance
    return t, steps


def _make_partial_kernel(tile_rows, with_bce, use_mxu_colsums):
    """Kernel accumulating per-(packed-)column partial sums into (8, CP) blocks."""

    def kernel(p_ref, y_ref, *out_refs):
        tp_ref, sp_ref, sy_ref = out_refs[0], out_refs[1], out_refs[2]
        bce_ref = out_refs[3] if with_bce else None

        @pl.when(pl.program_id(1) == 0)
        def _init():
            tp_ref[...] = jnp.zeros_like(tp_ref)
            sp_ref[...] = jnp.zeros_like(sp_ref)
            sy_ref[...] = jnp.zeros_like(sy_ref)
            if with_bce:
                bce_ref[...] = jnp.zeros_like(bce_ref)

        p_raw = p_ref[...]
        y_raw = y_ref[...]
        p = p_raw.astype(jnp.float32)
        y = y_raw.astype(jnp.float32)
        cp = p.shape[-1]

        def fold8(x):
            # Sublane-split reshape (layout-preserving) + full-vreg VPU adds;
            # the final 8->1 cross-sublane fold is deferred to the JAX epilogue.
            return jnp.sum(x.reshape(tile_rows // _SUB, _SUB, cp), axis=0)

        tp_ref[...] += fold8(p * y)

        if use_mxu_colsums:
            # Offload the plain column sums to the (otherwise idle) MXU.
            # Every sublane of the result holds the full column sum; the epilogue
            # reads sublane 0 only.
            ones_p = jnp.ones((_SUB, tile_rows), dtype=p_raw.dtype)
            ones_y = jnp.ones((_SUB, tile_rows), dtype=y_raw.dtype)
            sp_ref[...] += jnp.dot(ones_p, p_raw,
                                   preferred_element_type=jnp.float32,
                                   precision=lax.Precision.HIGHEST)
            sy_ref[...] += jnp.dot(ones_y, y_raw,
                                   preferred_element_type=jnp.float32,
                                   precision=lax.Precision.HIGHEST)
        else:
            sp_ref[...] += fold8(p)
            sy_ref[...] += fold8(y)

        if with_bce:
            # F.binary_cross_entropy semantics: clamp log terms at -100.
            log_p = jnp.maximum(jnp.log(p), -100.0)
            log_1mp = jnp.maximum(jnp.log(1.0 - p), -100.0)
            # Accumulate the signed sum; the global negation happens in the epilogue.
            bce_ref[...] += fold8(log_1mp + y * (log_p - log_1mp))

    return kernel


def fbeta_loss(p, y, *, beta=0.8, bce=False, factor=1.0,
               max_tile_rows=None, use_mxu_colsums=None):
    """Pallas TPU implementation of FbetaLoss.forward. Returns a scalar float32."""
    assert p.shape == y.shape and p.ndim == 2
    N, C = p.shape
    assert N > 0 and C > 0
    n_elems = N * C

    if use_mxu_colsums is None:
        use_mxu_colsums = _default_use_mxu_colsums()
    use_mxu_colsums = bool(use_mxu_colsums)
    with_bce = bool(bce)

    # ---- lane-dense packing: (N, C) -> (M, g*C), g*C a multiple of 128 ----
    g = 1 if C >= 128 else (128 // math.gcd(C, 128))
    CP = g * C
    M0 = -(-N // g)
    per_core = -(-M0 // _N_SPLIT)

    p_isz = jnp.dtype(p.dtype).itemsize
    y_isz = jnp.dtype(y.dtype).itemsize
    vmem_cap = _vmem_capacity_bytes()
    budget = 14 * MIB if vmem_cap <= 64 * MIB else 22 * MIB   # v7x vs v5e/v6e

    tile_rows, steps = _choose_tile_rows(per_core, CP, p_isz, y_isz, with_bce,
                                         budget, max_tile_rows)

    # ---- zero-pad the batch: mask-free kernel, exact divisibility everywhere ----
    # Zero rows contribute 0 to tp/sum_p/sum_y and (with the -100 clamp) 0 to BCE.
    M_pad = _N_SPLIT * steps * tile_rows
    N_pad = M_pad * g
    if N_pad != N:
        p = jnp.pad(p, ((0, N_pad - N), (0, 0)))
        y = jnp.pad(y, ((0, N_pad - N), (0, 0)))
    p2 = p.reshape(M_pad, CP)
    y2 = y.reshape(M_pad, CP)

    kernel = _make_partial_kernel(tile_rows, with_bce, use_mxu_colsums)

    n_outs = 4 if with_bce else 3
    out_shape = tuple(jax.ShapeDtypeStruct((_N_SPLIT * _SUB, CP), jnp.float32)
                      for _ in range(n_outs))
    out_specs = tuple(pl.BlockSpec((_SUB, CP), lambda c, i: (c, 0))
                      for _ in range(n_outs))
    in_specs = [pl.BlockSpec((tile_rows, CP), lambda c, i: (c * steps + i, 0)),
                pl.BlockSpec((tile_rows, CP), lambda c, i: (c * steps + i, 0))]

    # Explicit VMEM limit with headroom over our (lane-padding-aware) estimate.
    lanes = -(-CP // 128) * 128
    work_copies = 7 if with_bce else 4
    per_row_bytes = lanes * ((p_isz + y_isz) * 2 + 4 * work_copies)
    footprint = tile_rows * per_row_bytes + n_outs * 2 * _SUB * lanes * 4
    vmem_limit = int(min(int(0.85 * vmem_cap),
                         max(32 * MIB, 2 * footprint + 16 * MIB)))

    n_pad_elems = M_pad * CP
    cost = pl.CostEstimate(
        flops=(6 + (5 if with_bce else 0)) * n_pad_elems,
        transcendentals=(2 * n_pad_elems) if with_bce else 0,
        bytes_accessed=n_pad_elems * (p_isz + y_isz)
        + 4 * _N_SPLIT * _SUB * CP * n_outs,
    )

    outs = pl.pallas_call(
        kernel,
        out_shape=out_shape,
        grid=(_N_SPLIT, int(steps)),
        in_specs=in_specs,
        out_specs=out_specs,
        compiler_params=pltpu.CompilerParams(
            dimension_semantics=("parallel", "arbitrary"),
            vmem_limit_bytes=vmem_limit),
        cost_estimate=cost,
    )(p2, y2)

    # ---- tiny O(C) epilogue in plain JAX: core + sublane + group folds ----
    tp = outs[0].reshape(_N_SPLIT * _SUB, g, C).sum(axis=(0, 1))
    if use_mxu_colsums:
        # MXU path: every sublane already holds the full per-core column sum.
        sum_p = outs[1].reshape(_N_SPLIT, _SUB, g, C)[:, 0].sum(axis=(0, 1))
        sum_y = outs[2].reshape(_N_SPLIT, _SUB, g, C)[:, 0].sum(axis=(0, 1))
    else:
        sum_p = outs[1].reshape(_N_SPLIT * _SUB, g, C).sum(axis=(0, 1))
        sum_y = outs[2].reshape(_N_SPLIT * _SUB, g, C).sum(axis=(0, 1))

    recall = tp / (sum_y + EPSILON)
    precision = tp / (sum_p + EPSILON)
    ma_r = jnp.mean(recall)
    ma_p = jnp.mean(precision)

    bs = float(beta) * float(beta)
    f_beta = (1.0 + bs) * ma_r * ma_p / (bs * ma_p + ma_r + EPSILON)
    floss = 1.0 - f_beta

    if with_bce:
        bce_mean = -jnp.sum(outs[3]) / n_elems   # negation folded out of the kernel
        floss = bce_mean + floss * float(factor)
    return floss.astype(jnp.float32)


def _fbeta_loss_ref(p, y, *, beta=0.8, bce=False, factor=1.0):
    """Pure-JAX reference for validation."""
    p = p.astype(jnp.float32)
    y = y.astype(jnp.float32)
    tp = jnp.sum(p * y, axis=0)
    recall = tp / (jnp.sum(y, axis=0) + EPSILON)
    precision = tp / (jnp.sum(p, axis=0) + EPSILON)
    ma_r = jnp.mean(recall)
    ma_p = jnp.mean(precision)
    bs = beta * beta
    f_beta = (1.0 + bs) * ma_r * ma_p / (bs * ma_p + ma_r + EPSILON)
    floss = 1.0 - f_beta
    if bce:
        log_p = jnp.maximum(jnp.log(p), -100.0)
        log_1mp = jnp.maximum(jnp.log(1.0 - p), -100.0)
        bce_mean = jnp.mean(-(y * log_p + (1.0 - y) * log_1mp))
        floss = bce_mean + floss * factor
    return floss


if __name__ == "__main__":
    # 1) Small multi-label problem: batch=16 samples, 8 labels (f32).
    N, C = 16, 8
    k_logits, k_labels = jax.random.split(jax.random.PRNGKey(0))
    p = jax.nn.sigmoid(jax.random.normal(k_logits, (N, C), dtype=jnp.float32))
    y = (jax.random.uniform(k_labels, (N, C)) > 0.5).astype(jnp.float32)

    loss = jax.block_until_ready(fbeta_loss(p, y, beta=0.8, bce=False, factor=1.0))
    ref = _fbeta_loss_ref(p, y, beta=0.8, bce=False, factor=1.0)
    assert jnp.allclose(loss, ref, rtol=1e-5, atol=1e-6), (loss, ref)

    loss_bce = jax.block_until_ready(fbeta_loss(p, y, beta=0.8, bce=True, factor=1.0))
    ref_bce = _fbeta_loss_ref(p, y, beta=0.8, bce=True, factor=1.0)
    assert jnp.allclose(loss_bce, ref_bce, rtol=1e-5, atol=1e-6), (loss_bce, ref_bce)

    # 2) Batch not divisible by the pack/tile factors -> exercises zero-row padding
    #    (mask-free kernel) with a forced small tile; also the MXU column-sum path.
    N2, C2 = 1000, 8
    k1, k2 = jax.random.split(jax.random.PRNGKey(1))
    p2 = jax.nn.sigmoid(jax.random.normal(k1, (N2, C2), dtype=jnp.float32))
    y2 = (jax.random.uniform(k2, (N2, C2)) > 0.5).astype(jnp.float32)
    ref2 = _fbeta_loss_ref(p2, y2, beta=0.8, bce=True, factor=0.5)
    loss2 = jax.block_until_ready(
        fbeta_loss(p2, y2, beta=0.8, bce=True, factor=0.5, max_tile_rows=128))
    assert jnp.allclose(loss2, ref2, rtol=1e-5, atol=1e-5), (loss2, ref2)
    loss2m = jax.block_until_ready(
        fbeta_loss(p2, y2, beta=0.8, bce=True, factor=0.5, max_tile_rows=128,
                   use_mxu_colsums=True))
    assert jnp.allclose(loss2m, ref2, rtol=1e-5, atol=1e-5), (loss2m, ref2)

    # 3) bf16 inputs + lane-dense packing (g=16 -> CP=128), multi-step grid per core,
    #    with and without the MXU column-sum offload.
    N3, C3 = 4096, 8
    k3, k4 = jax.random.split(jax.random.PRNGKey(2))
    p3 = jax.nn.sigmoid(jax.random.normal(k3, (N3, C3), dtype=jnp.float32)).astype(jnp.bfloat16)
    y3 = (jax.random.uniform(k4, (N3, C3)) > 0.5).astype(jnp.bfloat16)
    ref3 = _fbeta_loss_ref(p3, y3, beta=0.8, bce=False, factor=1.0)
    loss3 = jax.block_until_ready(
        fbeta_loss(p3, y3, beta=0.8, bce=False, factor=1.0, max_tile_rows=64))
    assert jnp.allclose(loss3, ref3, rtol=1e-4, atol=1e-4), (loss3, ref3)
    loss3m = jax.block_until_ready(
        fbeta_loss(p3, y3, beta=0.8, bce=False, factor=1.0, max_tile_rows=64,
                   use_mxu_colsums=True))
    assert jnp.allclose(loss3m, ref3, rtol=1e-4, atol=1e-4), (loss3m, ref3)

    # 4) Wide-label case (C >= 128 -> g=1, no packing), default auto-tiling.
    N4, C4 = 512, 256
    k5, k6 = jax.random.split(jax.random.PRNGKey(3))
    p4 = jax.nn.sigmoid(jax.random.normal(k5, (N4, C4), dtype=jnp.float32))
    y4 = (jax.random.uniform(k6, (N4, C4)) > 0.5).astype(jnp.float32)
    ref4 = _fbeta_loss_ref(p4, y4, beta=0.8, bce=True, factor=1.0)
    loss4 = jax.block_until_ready(fbeta_loss(p4, y4, beta=0.8, bce=True, factor=1.0))
    assert jnp.allclose(loss4, ref4, rtol=1e-5, atol=1e-5), (loss4, ref4)

    print("KERNEL_OK")
</pallas_src>

<mosaic_0001>
module attributes {stable_mosaic.version = 11 : i64} {
  func.func @kernel(%arg0: i32, %arg1: i32, %arg2: memref<16x128xf32, #tpu.memory_space<vmem>>, %arg3: memref<16x128xf32, #tpu.memory_space<vmem>>, %arg4: memref<8x128xf32, #tpu.memory_space<vmem>>, %arg5: memref<8x128xf32, #tpu.memory_space<vmem>>, %arg6: memref<8x128xf32, #tpu.memory_space<vmem>>) attributes {dimension_semantics = [#tpu.dimension_semantics<parallel>, #tpu.dimension_semantics<arbitrary>], iteration_bounds = array<i64: 2, 1>, scalar_prefetch = 0 : i64, scratch_operands = 0 : i64, tpu.core_type = #tpu.core_type<tc>, window_params = [{transform_indices = @transform_0, window_bounds = array<i64: 16, 128>}, {transform_indices = @transform_1, window_bounds = array<i64: 16, 128>}, {transform_indices = @transform_2, window_bounds = array<i64: 8, 128>}, {transform_indices = @transform_3, window_bounds = array<i64: 8, 128>}, {transform_indices = @transform_4, window_bounds = array<i64: 8, 128>}]} {
    %c0_i32 = arith.constant 0 : i32
    %0 = arith.cmpi eq, %arg1, %c0_i32 : i32
    %1 = arith.extui %0 : i1 to i32
    %c0_i32_0 = arith.constant 0 : i32
    %2 = arith.cmpi ne, %1, %c0_i32_0 : i32
    scf.if %2 {
      %cst_18 = arith.constant 0.000000e+00 : f32
      %21 = vector.broadcast %cst_18 : f32 to vector<8x128xf32>
      %c0_19 = arith.constant 0 : index
      %c0_20 = arith.constant 0 : index
      %22 = vector.load %arg4[%c0_19, %c0_20] : memref<8x128xf32, #tpu.memory_space<vmem>>, vector<8x128xf32>
      tpu.vector_store %arg4[%c0_19, %c0_20], %21 {strides = array<i32>} : memref<8x128xf32, #tpu.memory_space<vmem>>, vector<8x128xf32>,
      %cst_21 = arith.constant 0.000000e+00 : f32
      %23 = vector.broadcast %cst_21 : f32 to vector<8x128xf32>
      %c0_22 = arith.constant 0 : index
      %c0_23 = arith.constant 0 : index
      %24 = vector.load %arg5[%c0_22, %c0_23] : memref<8x128xf32, #tpu.memory_space<vmem>>, vector<8x128xf32>
      tpu.vector_store %arg5[%c0_22, %c0_23], %23 {strides = array<i32>} : memref<8x128xf32, #tpu.memory_space<vmem>>, vector<8x128xf32>,
      %cst_24 = arith.constant 0.000000e+00 : f32
      %25 = vector.broadcast %cst_24 : f32 to vector<8x128xf32>
      %c0_25 = arith.constant 0 : index
      %c0_26 = arith.constant 0 : index
      %26 = vector.load %arg6[%c0_25, %c0_26] : memref<8x128xf32, #tpu.memory_space<vmem>>, vector<8x128xf32>
      tpu.vector_store %arg6[%c0_25, %c0_26], %25 {strides = array<i32>} : memref<8x128xf32, #tpu.memory_space<vmem>>, vector<8x128xf32>,
    } else {
    }
    %c0 = arith.constant 0 : index
    %c0_1 = arith.constant 0 : index
    %3 = vector.load %arg2[%c0, %c0_1] : memref<16x128xf32, #tpu.memory_space<vmem>>, vector<16x128xf32>
    %c0_2 = arith.constant 0 : index
    %c0_3 = arith.constant 0 : index
    %4 = vector.load %arg3[%c0_2, %c0_3] : memref<16x128xf32, #tpu.memory_space<vmem>>, vector<16x128xf32>
    %c0_4 = arith.constant 0 : index
    %c0_5 = arith.constant 0 : index
    %5 = vector.load %arg4[%c0_4, %c0_5] : memref<8x128xf32, #tpu.memory_space<vmem>>, vector<8x128xf32>
    %6 = arith.mulf %3, %4 : vector<16x128xf32>
    %7 = vector.shape_cast %6 : vector<16x128xf32> to vector<2x8x128xf32>
    %cst = arith.constant dense<0.000000e+00> : vector<8x128xf32>
    %8 = vector.multi_reduction <add>, %7, %cst [0] : vector<2x8x128xf32> to vector<8x128xf32>
    %9 = arith.addf %5, %8 : vector<8x128xf32>
    %c0_6 = arith.constant 0 : index
    %c0_7 = arith.constant 0 : index
    %10 = vector.load %arg4[%c0_6, %c0_7] : memref<8x128xf32, #tpu.memory_space<vmem>>, vector<8x128xf32>
    tpu.vector_store %arg4[%c0_6, %c0_7], %9 {strides = array<i32>} : memref<8x128xf32, #tpu.memory_space<vmem>>, vector<8x128xf32>,
    %c0_8 = arith.constant 0 : index
    %c0_9 = arith.constant 0 : index
    %11 = vector.load %arg5[%c0_8, %c0_9] : memref<8x128xf32, #tpu.memory_space<vmem>>, vector<8x128xf32>
    %12 = vector.shape_cast %3 : vector<16x128xf32> to vector<2x8x128xf32>
    %cst_10 = arith.constant dense<0.000000e+00> : vector<8x128xf32>
    %13 = vector.multi_reduction <add>, %12, %cst_10 [0] : vector<2x8x128xf32> to vector<8x128xf32>
    %14 = arith.addf %11, %13 : vector<8x128xf32>
    %c0_11 = arith.constant 0 : index
    %c0_12 = arith.constant 0 : index
    %15 = vector.load %arg5[%c0_11, %c0_12] : memref<8x128xf32, #tpu.memory_space<vmem>>, vector<8x128xf32>
    tpu.vector_store %arg5[%c0_11, %c0_12], %14 {strides = array<i32>} : memref<8x128xf32, #tpu.memory_space<vmem>>, vector<8x128xf32>,
    %c0_13 = arith.constant 0 : index
    %c0_14 = arith.constant 0 : index
    %16 = vector.load %arg6[%c0_13, %c0_14] : memref<8x128xf32, #tpu.memory_space<vmem>>, vector<8x128xf32>
    %17 = vector.shape_cast %4 : vector<16x128xf32> to vector<2x8x128xf32>
    %cst_15 = arith.constant dense<0.000000e+00> : vector<8x128xf32>
    %18 = vector.multi_reduction <add>, %17, %cst_15 [0] : vector<2x8x128xf32> to vector<8x128xf32>
    %19 = arith.addf %16, %18 : vector<8x128xf32>
    %c0_16 = arith.constant 0 : index
    %c0_17 = arith.constant 0 : index
    %20 = vector.load %arg6[%c0_16, %c0_17] : memref<8x128xf32, #tpu.memory_space<vmem>>, vector<8x128xf32>
    tpu.vector_store %arg6[%c0_16, %c0_17], %19 {strides = array<i32>} : memref<8x128xf32, #tpu.memory_space<vmem>>, vector<8x128xf32>,
    return
  }
  func.func @transform_0(%arg0: i32, %arg1: i32) -> (i32, i32) {
    %c1_i32 = arith.constant 1 : i32
    %0 = arith.muli %arg0, %c1_i32 : i32
    %1 = arith.addi %0, %arg1 : i32
    %c0_i32 = arith.constant 0 : i32
    %c0_i32_0 = arith.constant 0 : i32
    return %1, %c0_i32 : i32, i32
  }
  func.func @transform_1(%arg0: i32, %arg1: i32) -> (i32, i32) {
    %c1_i32 = arith.constant 1 : i32
    %0 = arith.muli %arg0, %c1_i32 : i32
    %1 = arith.addi %0, %arg1 : i32
    %c0_i32 = arith.constant 0 : i32
    %c0_i32_0 = arith.constant 0 : i32
    return %1, %c0_i32 : i32, i32
  }
  func.func @transform_2(%arg0: i32, %arg1: i32) -> (i32, i32) {
    %c0_i32 = arith.constant 0 : i32
    %c0_i32_0 = arith.constant 0 : i32
    return %arg0, %c0_i32 : i32, i32
  }
  func.func @transform_3(%arg0: i32, %arg1: i32) -> (i32, i32) {
    %c0_i32 = arith.constant 0 : i32
    %c0_i32_0 = arith.constant 0 : i32
    return %arg0, %c0_i32 : i32, i32
  }
  func.func @transform_4(%arg0: i32, %arg1: i32) -> (i32, i32) {
    %c0_i32 = arith.constant 0 : i32
    %c0_i32_0 = arith.constant 0 : i32
    return %arg0, %c0_i32 : i32, i32
  }
}

</mosaic_0001>

<bundles_post_ra>
// kernel: tpu_custom_call.1
= control target key start
LH: loop header
LB: loop body
LE: loop exit
PB: predicated region body
PF: predicated region fallthrough
CT: control target
= control target key end

     0   :  { %s1194_s0 = inlined_call_operand.hbm [shape: f32[32,128], index: 0, kind: input, shape index: {}]   ;;  %s1195_s1 = inlined_call_operand.hbm [shape: f32[32,128], index: 1, kind: input, shape index: {}]   ;;  %s1196_s2 = inlined_call_operand.hbm [shape: f32[16,128], index: 2, kind: output, shape index: {0}]   ;;  %s1197_s3 = inlined_call_operand.hbm [shape: f32[16,128], index: 3, kind: output, shape index: {1}]   ;;  %s1198_s4 = inlined_call_operand.hbm [shape: f32[16,128], index: 4, kind: output, shape index: {2}]  }
   0x1   :  { %1204 = sst [smem:[#allocation15_spill]] %s1194_s0 }
   0x2   :  { %1205 = sst [smem:[#allocation16_spill]] %s1195_s1 }
   0x3   :  { %10 = vsyncpa [#allocation3], 0 }
   0x4   :  { %12 = vsyncpa [#allocation3 + $0x1], 0 }
   0x5   :  { %13 = vsyncpa [#allocation6], 0 }
   0x6   :  { %15 = vsyncpa [#allocation6 + $0x1], 0 }
   0x7   :  { %16 = vsyncpa [#allocation4], 0 }
   0x8   :  { %18 = vsyncpa [#allocation4 + $0x1], 0 }
   0x9   :  { %19 = vsyncpa [#allocation9], 0 }
   0xa   :  { %21 = vsyncpa [#allocation9 + $0x1], 0  ;;  %s881_s15 = smov 0   ;;  %s883_s16 = smov 0  }
   0xb   :  { %s885_s17 = smov 0   ;;  %s887_s18 = smov 0  }
   0xc   :  { %s889_s19 = smov 0   ;;  %s891_s20 = smov 0  }
   0xd LB: > { %s912_s21 = sadd.s32 4294967295, %s847_s20   ;;  %s1199_s22 = sadd.s32 4294967294, %s847_s20   ;;  %s847_s20 = sphi %s891_s20, %s27_s20   ;;  %s843_s19 = sphi %s889_s19, %s1226_s19   ;;  %s839_s18 = sphi %s887_s18, %s1225_s18   ;;  %s835_s17 = sphi %s885_s17, %s1224_s17   ;;  %s831_s16 = sphi %s883_s16, %s1223_s16   ;;  %s827_s15 = sphi %s881_s15, %s1222_s15  }
   0xe   : > { %s39_s23 = sadd.s32 1, %s843_s19  ;;  %s48_s24 = sadd.s32 1, %s835_s17 }
   0xf   : > { %p41_p0 = scmp.ge.s32.totalorder %s39_s23, 2  ;;  %p55_p1 = scmp.ne.s32.totalorder %s835_s17, %s831_s16 }
  0x10   : > { %p56_p2 = scmp.eq.s32.totalorder %s847_s20, 0  ;;  %p61_p3 = scmp.ne.s32.totalorder %s831_s16, %s827_s15 }
  0x11   : > { %s1228_s23 = smov (%p41_p0, %s39_s23), 0  ;;  %p62_p5 = scmp.eq.s32.totalorder %s912_s21, 0 }
  0x12   : > { %p924_p4 = por %p56_p2, %p55_p1  ;;  %s45_s26 = ssub.s32 %s843_s19, %s1228_s23 }
  0x13   : > { %p113_p6 = scmp.eq.s32.totalorder %s912_s21, 1  ;;  %p46_p7 = scmp.eq.s32.totalorder %s45_s26, 0 }
  0x14   : > { %p932_p8 = por %p62_p5, %p61_p3  ;;  %p119_p10 = scmp.eq.s32.totalorder %s1199_s22, 1 }
  0x15   : > { %p936_p9 = por %p113_p6, %p55_p1  ;;  %p588_p13 = scmp.lt.s32.totalorder %s847_s20, 2 }
  0x16   : > { %s1207_s27 = scalar_select %p932_p8, 1, 0 }
  0x17   : > { %s1208_s28 = scalar_select %p936_p9, 1, 0 }
  0x18   : > { %s943_s29 = scalar_select %p46_p7, %s835_s17, %s48_s24  }
  0x19   : > { %p945_p11 = por %p119_p10, %p61_p3  ;;  %s952_s5 = sand.u32 1, %s835_s17  }
  0x1a   : > { %s539_s6 = sshll.u32 %s952_s5, 4  ;;  %s559_s7 = sshll.u32 %s843_s19, 8 }
  0x1b   : > { %s1209_s30 = scalar_select %p945_p11, 1, 0 }
  0x1c   : > { %s1210_s0 = sld [smem:[#allocation15_spill]]  ;;  %s195_s11 = scalar_lea.vmem [#allocation2], %s539_s6 }
  0x1d   : > { %s203_s12 = sshll.u32 %s195_s11, 4  ;;  %p969_p0 = pnand %p588_p13, %p924_p4  ;;  %s965_s12 = int_to_ptr.vmem [resolvable:$true] %s203_s12 }
  0x1e   : > { %s192_s14 = scalar_lea.sflag [#allocation3], %s952_s5 }
  0x1f   : > { %p643_p3 = pneg %p969_p0 }
  0x22   : > { %s961_s10 = scalar_lea.hbm %s1210_s0, %s559_s7  ;;  %s646_s25 = scalar_lea.hbm %s1210_s0, 512 }
  0x23   : > { %s641_s24 = scalar_lea.hbm %s961_s10, 256  ;;  %p647_p4 = scmp.lt.u32.totalorder %s961_s10, %s1210_s0 }
  0x24   : > { %p642_p2 = scmp.ne.s32.totalorder %s961_s10, %s641_s24  ;;  %p648_p7 = scmp.lt.u32.totalorder %s646_s25, %s641_s24 }
  0x25   : > { %p650_p13 = scmp.lt.u32.totalorder %s641_s24, %s961_s10 }
  0x26   : > { %p644_p5 = pnand %p643_p3, %p642_p2  ;;  %p649_p10 = por %p648_p7, %p647_p4 }
  0x28   : > { %p645_p6 = pneg %p644_p5  ;;  %p651_p12 = por %p650_p13, %p649_p10 }
  0x2a   : > { %p652_p1 = pnand %p651_p12, %p645_p6 }
  0x2c   : > { %655 = shalt.err (!%p652_p1)
}
  0x2d   : > { %s656_s22 = scalar_lea.vmem %s965_s12, 256  ;;  %s849_s26 = smov [#allocation2]  }
  0x2e   : > { %p657_p2 = scmp.ne.s32.totalorder %s965_s12, %s656_s22  ;;  %s661_s8 = sshll.u32 %s849_s26, 4  ;;  %s662_s8 = int_to_ptr.vmem [resolvable:$false] %s661_s8 }
  0x2f   : > { %s663_s9 = scalar_lea.vmem %s662_s8, 512  ;;  %p664_p9 = scmp.lt.s32.totalorder %s965_s12, %s662_s8 }
  0x30   : > { %p659_p5 = pnand %p657_p2, %p643_p3  ;;  %p665_p4 = scmp.lt.s32.totalorder %s663_s9, %s656_s22 }
  0x32   : > { %p660_p11 = pneg %p659_p5  ;;  %p666_p7 = por %p665_p4, %p664_p9 }
  0x34   : > { %p667_p10 = pnand %p666_p7, %p660_p11 }
  0x36   : > { %670 = shalt.err (!%p667_p10)
}
  0x37   : > { %s1201_s24 = smov 128   ;;  %s851_s25 = smov 8  }
  0x38   : > { %574 = dma.hbm_to_vmem [thread:$0]  (!%p969_p0), %s961_s10, 256, %s965_s12, %s192_s14, %s1201_s24, %s1201_s24, %s851_s25  }
  0x39   : > { %p233_p9 = scmp.lt.s32.totalorder %s847_s20, 3  ;;  %s1212_s1 = sld [smem:[#allocation16_spill]] }
  0x3a   : > { %p1213_p11 = scmp.ge.s32.totalorder %s847_s20, 1  ;;  %s217_s9 = scalar_lea.vmem [#allocation5], %s539_s6 }
  0x3b   : > { %s225_s0 = sshll.u32 %s217_s9, 4  ;;  %s214_s10 = scalar_lea.sflag [#allocation6], %s952_s5  ;;  %s1021_s0 = int_to_ptr.vmem [resolvable:$true] %s225_s0 }
  0x3c   : > { %p1015_p12 = pnand %p1213_p11, %p233_p9 }
  0x3f   : > { %s1011_s26 = scalar_lea.hbm %s1212_s1, %s559_s7  ;;  %s676_s22 = scalar_lea.hbm %s1212_s1, 512 }
  0x40   : > { %s671_s12 = scalar_lea.hbm %s1011_s26, 256  ;;  %p677_p2 = scmp.lt.u32.totalorder %s1011_s26, %s1212_s1 }
  0x41   : > { %p672_p1 = scmp.ne.s32.totalorder %s1011_s26, %s671_s12  ;;  %p678_p5 = scmp.lt.u32.totalorder %s676_s22, %s671_s12 }
  0x42   : > { %p680_p7 = scmp.lt.u32.totalorder %s671_s12, %s1011_s26 }
  0x43   : > { %p674_p6 = pnand %p672_p1, %p643_p3  ;;  %p679_p4 = por %p678_p5, %p677_p2 }
  0x45   : > { %p675_p13 = pneg %p674_p6  ;;  %p681_p10 = por %p680_p7, %p679_p4 }
  0x47   : > { %p682_p9 = pnand %p681_p10, %p675_p13 }
  0x49   : > { %685 = shalt.err (!%p682_p9)
}
  0x4a   : > { %s686_s6 = scalar_lea.vmem %s1021_s0, 256  ;;  %s852_s9 = smov [#allocation5]  }
  0x4b   : > { %p687_p11 = scmp.ne.s32.totalorder %s1021_s0, %s686_s6  ;;  %s691_s7 = sshll.u32 %s852_s9, 4  ;;  %s692_s7 = int_to_ptr.vmem [resolvable:$false] %s691_s7 }
  0x4c   : > { %s693_s24 = scalar_lea.vmem %s692_s7, 512  ;;  %p694_p8 = scmp.lt.s32.totalorder %s1021_s0, %s692_s7 }
  0x4d   : > { %p689_p1 = pnand %p687_p11, %p643_p3  ;;  %p695_p2 = scmp.lt.s32.totalorder %s693_s24, %s686_s6 }
  0x4f   : > { %p690_p6 = pneg %p689_p1  ;;  %p696_p5 = por %p695_p2, %p694_p8 }
  0x51   : > { %p697_p4 = pnand %p696_p5, %p690_p6 }
  0x53   : > { %700 = shalt.err (!%p697_p4)
}
  0x54   : > { %s1215_s12 = smov 128   ;;  %237 = sbr.rel (%p1015_p12) target bundleno = 169 (0xa9), region = 28 }
  0x55   : > { %577 = dma.hbm_to_vmem [thread:$0]  (!%p969_p0), %s1011_s26, 256, %s1021_s0, %s214_s10, %s1215_s12, %s1215_s12, %s851_s25  }
  0x56   : > { %s1055_s14 = sand.u32 (!%p1015_p12), 1, %s831_s16   ;;  %p1216_p8 = scmp.ne.s32.totalorder (!%p1015_p12), %s1207_s27, 0 }
  0x57   : > { %s546_s22 = sshll.u32 (!%p1015_p12), %s1055_s14, 4  ;;  %s240_s11 = scalar_lea.sflag (!%p1015_p12), [#allocation3], %s1055_s14 }
  0x58   : > { %s243_s13 = scalar_lea.vmem (!%p1015_p12), [#allocation2], %s546_s22 }
  0x5b   : > { %810 = dma.done.wait (%p1216_p8), %s240_s11, 256  }
  0x5c   : > { %812 = vsyncadd (%p1216_p8), %s240_s11, 4294967040  ;;  %s249_s0 = scalar_lea.sflag [#allocation6], %s1055_s14  ;;  %s252_s5 = scalar_lea.vmem [#allocation5], %s546_s22 }
  0x5d   : > { %814 = dma.done.wait (%p1216_p8), %s249_s0, 256  }
  0x5e   : > { %816 = vsyncadd (%p1216_p8), %s249_s0, 4294967040  ;;  %s1069_s25 = sshll.u32 %s1055_s14, 3  ;;  %s326_s26 = sand.u32 1, %s912_s21   ;;  %v303_v0 = vld [vmem:[%s243_s13] sm:$0xff]  ;;  %v304_v1 = vld [vmem:[%s243_s13 + $0x8] sm:$0xff] }
  0x5f   : > { %s291_s8 = scalar_lea.vmem [#allocation10], %s1069_s25  ;;  %v305_v2 = vld [vmem:[%s252_s5] sm:$0xff]  ;;  %s554_s6 = sshll.u32 %s839_s18, 7  ;;  %v314_v3 = vadd.f32 %v304_v1, %v303_v0  ;;  %v306_v4 = vld [vmem:[%s252_s5 + $0x8] sm:$0xff] }
  0x60   : > { %s371_s10 = sshll.u32 %s291_s8, 4  ;;  %s284_s9 = scalar_lea.vmem [#allocation8], %s1069_s25  ;;  %v308_v5 = vmul.f32 %v305_v2, %v303_v0  ;;  %v309_v6 = vmul.f32 %v306_v4, %v304_v1  ;;  %v318_v7 = vadd.f32 %v306_v4, %v305_v2  ;;  %s1075_s10 = int_to_ptr.vmem [resolvable:$true] %s371_s10 }
  0x61   : > { %s358_s7 = sshll.u32 %s284_s9, 4  ;;  %s1203_s27 = scalar_lea.vmem [#allocation7], %s1069_s25  ;;  %316 = vst [vmem:[%s284_s9] sm:$0xff] %v314_v3  ;;  %s1085_s7 = int_to_ptr.vmem [resolvable:$true] %s358_s7 }
  0x62   : > { %s345_s21 = sshll.u32 %s1203_s27, 4  ;;  %s1083_s22 = scalar_lea.hbm %s1197_s3, %s554_s6  ;;  %v310_v8 = vadd.f32 %v309_v6, %v308_v5  ;;  %320 = vst [vmem:[%s291_s8] sm:$0xff] %v318_v7  ;;  %s1097_s21 = int_to_ptr.vmem [resolvable:$true] %s345_s21 }
  0x63   : > { %s1090_s13 = scalar_lea.hbm %s1198_s4, %s554_s6  ;;  %s1095_s27 = scalar_lea.hbm %s1196_s2, %s554_s6 }
  0x64   : > { %s1099_s24 = scalar_lea.sflag [#allocation9], %s326_s26  ;;  %s701_s12 = scalar_lea.vmem %s1085_s7, 128 }
  0x65   : > { %p702_p0 = scmp.ne.s32.totalorder %s1085_s7, %s701_s12  ;;  %p1217_p3 = scmp.ne.s32.totalorder %s1208_s28, 0 }
  0x66   : > { %s853_s1 = smov [#allocation8]  }
  0x67   : > { %p703_p12 = pnand %p702_p0, %p1217_p3  ;;  %s705_s18 = sshll.u32 %s853_s1, 4  ;;  %s706_s18 = int_to_ptr.vmem [resolvable:$false] %s705_s18 }
  0x68   : > { %s707_s11 = scalar_lea.vmem %s706_s18, 256  ;;  %p708_p7 = scmp.lt.s32.totalorder %s1085_s7, %s706_s18 }
  0x69   : > { %p704_p13 = pneg %p703_p12  ;;  %p709_p10 = scmp.lt.s32.totalorder %s707_s11, %s701_s12 }
  0x6b   : > { %p710_p9 = por %p709_p10, %p708_p7 }
  0x6d   : > { %p711_p11 = pnand %p710_p9, %p704_p13 }
  0x6f   : > { %714 = shalt.err (!%p711_p11)
}
  0x70   : > { %s715_s26 = scalar_lea.hbm %s1083_s22, 128  ;;  %s719_s1 = scalar_lea.hbm %s1197_s3, 256 }
  0x71   : > { %p716_p1 = scmp.ne.s32.totalorder %s1083_s22, %s715_s26  ;;  %p720_p5 = scmp.lt.u32.totalorder %s1083_s22, %s1197_s3 }
  0x72   : > { %p721_p4 = scmp.lt.u32.totalorder %s719_s1, %s715_s26  ;;  %p723_p0 = scmp.lt.u32.totalorder %s715_s26, %s1083_s22 }
  0x73   : > { %p717_p6 = pnand %p716_p1, %p1217_p3 }
  0x74   : > { %p722_p8 = por %p721_p4, %p720_p5 }
  0x75   : > { %p718_p2 = pneg %p717_p6 }
  0x76   : > { %p724_p12 = por %p723_p0, %p722_p8 }
  0x78   : > { %p725_p13 = pnand %p724_p12, %p718_p2 }
  0x7a   : > { %728 = shalt.err (!%p725_p13)
}
  0x7b   : > { %566 = dma.vmem_to_hbm [thread:$0]  (%p1217_p3), %s1085_s7, 128, %s1083_s22, %s1099_s24  }
  0x7c   : > { %s729_s5 = scalar_lea.vmem %s1075_s10, 128  ;;  %s854_s12 = smov [#allocation10]  }
  0x7d   : > { %p730_p7 = scmp.ne.s32.totalorder %s1075_s10, %s729_s5  ;;  %s733_s18 = sshll.u32 %s854_s12, 4  ;;  %s734_s18 = int_to_ptr.vmem [resolvable:$false] %s733_s18 }
  0x7e   : > { %s735_s11 = scalar_lea.vmem %s734_s18, 256  ;;  %p736_p11 = scmp.lt.s32.totalorder %s1075_s10, %s734_s18 }
  0x7f   : > { %p731_p10 = pnand %p730_p7, %p1217_p3  ;;  %p737_p1 = scmp.lt.s32.totalorder %s735_s11, %s729_s5 }
  0x81   : > { %p732_p9 = pneg %p731_p10  ;;  %p738_p6 = por %p737_p1, %p736_p11 }
  0x83   : > { %p739_p2 = pnand %p738_p6, %p732_p9 }
  0x85   : > { %742 = shalt.err (!%p739_p2)
}
  0x86   : > { %s743_s7 = scalar_lea.hbm %s1090_s13, 128  ;;  %s747_s8 = scalar_lea.hbm %s1198_s4, 256 }
  0x87   : > { %p744_p5 = scmp.ne.s32.totalorder %s1090_s13, %s743_s7  ;;  %p748_p0 = scmp.lt.u32.totalorder %s1090_s13, %s1198_s4 }
  0x88   : > { %p749_p12 = scmp.lt.u32.totalorder %s747_s8, %s743_s7  ;;  %p751_p7 = scmp.lt.u32.totalorder %s743_s7, %s1090_s13 }
  0x89   : > { %p745_p4 = pnand %p744_p5, %p1217_p3 }
  0x8a   : > { %p750_p13 = por %p749_p12, %p748_p0 }
  0x8b   : > { %p746_p8 = pneg %p745_p4 }
  0x8c   : > { %p752_p10 = por %p751_p7, %p750_p13 }
  0x8e   : > { %p753_p9 = pnand %p752_p10, %p746_p8 }
  0x90   : > { %756 = shalt.err (!%p753_p9)
}
  0x91   : > { %567 = dma.vmem_to_hbm [thread:$0]  (%p1217_p3), %s1075_s10, 128, %s1090_s13, %s1099_s24  }
  0x92   : > { %s1218_s9 = scalar_lea.vmem [#allocation7], %s1069_s25  ;;  %s322_s0 = scalar_lea.sflag [#allocation4], %s1055_s14 }
  0x93   : > { %312 = vst [vmem:[%s1218_s9] sm:$0xff] %v310_v8  ;;  %s757_s5 = scalar_lea.vmem %s1097_s21, 128  ;;  %s855_s12 = smov [#allocation7]  }
  0x94   : > { %p758_p11 = scmp.ne.s32.totalorder %s1097_s21, %s757_s5  ;;  %s761_s18 = sshll.u32 %s855_s12, 4  ;;  %s762_s18 = int_to_ptr.vmem [resolvable:$false] %s761_s18 }
  0x95   : > { %s763_s11 = scalar_lea.vmem %s762_s18, 256  ;;  %p764_p2 = scmp.lt.s32.totalorder %s1097_s21, %s762_s18 }
  0x96   : > { %p759_p1 = pnand %p758_p11, %p1217_p3  ;;  %p765_p5 = scmp.lt.s32.totalorder %s763_s11, %s757_s5 }
  0x98   : > { %p760_p6 = pneg %p759_p1  ;;  %p766_p4 = por %p765_p5, %p764_p2 }
  0x9a   : > { %p767_p8 = pnand %p766_p4, %p760_p6 }
  0x9c   : > { %770 = shalt.err (!%p767_p8)
}
  0x9d   : > { %s771_s14 = scalar_lea.hbm %s1095_s27, 128  ;;  %s775_s13 = scalar_lea.hbm %s1196_s2, 256 }
  0x9e   : > { %p772_p0 = scmp.ne.s32.totalorder %s1095_s27, %s771_s14  ;;  %p776_p7 = scmp.lt.u32.totalorder %s1095_s27, %s1196_s2 }
  0x9f   : > { %p777_p10 = scmp.lt.u32.totalorder %s775_s13, %s771_s14  ;;  %p779_p11 = scmp.lt.u32.totalorder %s771_s14, %s1095_s27 }
  0xa0   : > { %p773_p12 = pnand %p772_p0, %p1217_p3 }
  0xa1   : > { %p778_p9 = por %p777_p10, %p776_p7 }
  0xa2   : > { %p774_p13 = pneg %p773_p12 }
  0xa3   : > { %p780_p1 = por %p779_p11, %p778_p9 }
  0xa5   : > { %p781_p6 = pnand %p780_p1, %p774_p13 }
  0xa7   : > { %784 = shalt.err (!%p781_p6)
}
  0xa8   : > { %565 = dma.vmem_to_hbm [thread:$0]  (%p1217_p3), %s1097_s21, 128, %s1095_s27, %s322_s0  }
  0xa9 PF: > { %s383_s22 = sand.u32 1, %s827_s15   ;;  %p1219_p2 = scmp.ne.s32.totalorder %s1209_s30, 0 }
  0xaa   : > { %p1220_p5 = scmp.ge.s32.totalorder %s847_s20, 2  ;;  %s384_s26 = scalar_lea.sflag [#allocation4], %s383_s22 }
  0xac   : > { %p579_p4 = pnand %p1220_p5, %p1219_p2 }
  0xae   : > { %818 = dma.done.wait (!%p579_p4), %s384_s26, 128  }
  0xaf   : > { %820 = vsyncadd (!%p579_p4), %s384_s26, 4294967168  ;;  %s1221_s8 = sadd.s32 4294967294, %s847_s20  }
  0xb0   : > { %s392_s6 = sand.u32 1, %s1221_s8  }
  0xb1   : > { %s393_s1 = scalar_lea.sflag [#allocation9], %s392_s6 }
  0xb2   : > { %822 = dma.done.wait (!%p579_p4), %s393_s1, 256  }
  0xb3   : > { %824 = vsyncadd (!%p579_p4), %s393_s1, 4294967040  ;;  %s27_s20 = sadd.s32 1, %s847_s20   ;;  %s1222_s15 = smov %s831_s16 }
  0xb4   : > { %p24_p3 = scmp.ge.s32.totalorder %s27_s20, 4   ;;  %s1223_s16 = smov %s835_s17 }
  0xb5   : > { %s1224_s17 = smov %s943_s29  ;;  %s1225_s18 = smov %s843_s19 }
  0xb6   : > { %s1226_s19 = smov %s1228_s23  ;;  %26 = sbr.rel (!%p24_p3) target bundleno = 13 (0xd), region = 122 }
  0xbd   :  { %407 = vsyncpa [#allocation3], 1 }
  0xbe   :  { %409 = vsyncpa [#allocation3 + $0x1], 1 }
  0xbf   :  { %410 = vsyncpa [#allocation6], 1 }
  0xc0   :  { %412 = vsyncpa [#allocation6 + $0x1], 1 }
  0xc1   :  { %413 = vsyncpa [#allocation4], 1 }
  0xc2   :  { %415 = vsyncpa [#allocation4 + $0x1], 1 }
  0xc3   :  { %416 = vsyncpa [#allocation9], 1 }
  0xc4   :  { %418 = vsyncpa [#allocation9 + $0x1], 1 }

</bundles_post_ra>
